<compile_context>
chip_gen: v7x
topology: tpu7x:2x2x1
jax: 0.10.0
libtpu: 0.0.40
codegen_flags: <defaults>
</compile_context>

<pallas_src>
import functools

import jax
import jax.numpy as jnp
from jax.experimental import pallas as pl
from jax.experimental.pallas import tpu as pltpu


def _identity_copy_kernel(x_ref, o_ref):
    # Pass-through: the abstract Encoder defines no transformation.
    o_ref[...] = x_ref[...]


# ~2 MiB per block -> with BlockSpec double-buffering (in + out), at most
# ~8 MiB resident: safe on v5e (16 MiB scoped default), v6e and v7x.
_TARGET_BLOCK_BYTES = 2 * 1024 * 1024


def _lane_dense_layout(total: int, itemsize: int):
    """Pick (rows, lane_width, block_rows) for a lane-dense 2D slab.

    Returns None if no lane width that is a multiple of 128 divides `total`.
    """
    for lane in (4096, 2048, 1024, 512, 256, 128):
        if total % lane != 0:
            continue
        rows = total // lane
        target_rows = max(1, _TARGET_BLOCK_BYTES // (lane * itemsize))
        if rows <= target_rows:
            # Whole slab fits in one comfortably-sized block.
            return rows, lane, rows
        # Largest multiple-of-8 divisor of `rows` not exceeding the target
        # (multiple of 8 satisfies the (8, 128) sublane constraint).
        block_rows = (min(rows, target_rows) // 8) * 8
        while block_rows >= 8:
            if rows % block_rows == 0:
                return rows, lane, block_rows
            block_rows -= 8
        # Fallback: one block covering everything (correct; only hit for
        # awkward row counts).
        return rows, lane, rows
    return None


@jax.jit
def encoder_forward(x: jax.Array) -> jax.Array:
    """Pallas implementation of the (abstract) Encoder forward.

    x: NCHW array. Returns an array identical to x. The output aliases the
    input buffer (input_output_aliases), so with a donated input no HBM
    round trip is needed; otherwise it is a lane-dense, large-block copy.
    """
    orig_shape = x.shape
    total = int(x.size)
    itemsize = int(jnp.dtype(x.dtype).itemsize)

    layout = _lane_dense_layout(total, itemsize)
    if layout is None:
        # Odd total element count: single full-array block (exempt from the
        # (8, 128) divisibility rule because block == full dims).
        rows, lane, block_rows = 1, total, 1
    else:
        rows, lane, block_rows = layout

    x2 = x.reshape(rows, lane)
    grid = (rows // block_rows,)  # "parallel": shardable across v7x's 2 TCs.

    out = pl.pallas_call(
        _identity_copy_kernel,
        out_shape=jax.ShapeDtypeStruct((rows, lane), x.dtype),
        grid=grid,
        in_specs=[pl.BlockSpec((block_rows, lane), lambda i: (i, 0))],
        out_specs=pl.BlockSpec((block_rows, lane), lambda i: (i, 0)),
        # Output aliases the input: the identity needs no fresh HBM buffer.
        input_output_aliases={0: 0},
        compiler_params=pltpu.CompilerParams(
            dimension_semantics=("parallel",),
            vmem_limit_bytes=32 * 1024 * 1024,
        ),
    )(x2)

    return out.reshape(orig_shape)


if __name__ == "__main__":
    key = jax.random.PRNGKey(0)
    # Small NCHW input consistent with a typical encoder entry point.
    x = jax.random.normal(key, (2, 4, 16, 16), dtype=jnp.float32)

    y = encoder_forward(x)
    jax.block_until_ready(y)

    # Identity semantics check (the only well-defined behavior for the
    # abstract base class's data flow).
    assert y.shape == x.shape and y.dtype == x.dtype
    assert bool(jnp.allclose(y, x))

    print("KERNEL_OK")
</pallas_src>

<mosaic_0001>
module attributes {stable_mosaic.version = 11 : i64} {
  func.func @_identity_copy_kernel(%arg0: i32, %arg1: memref<1x2048xf32, #tpu.memory_space<vmem>>, %arg2: memref<1x2048xf32, #tpu.memory_space<vmem>>) attributes {dimension_semantics = [#tpu.dimension_semantics<parallel>], iteration_bounds = array<i64: 1>, scalar_prefetch = 0 : i64, scratch_operands = 0 : i64, tpu.core_type = #tpu.core_type<tc>, window_params = [{transform_indices = @transform_0, window_bounds = array<i64: 1, 2048>}, {transform_indices = @transform_1, window_bounds = array<i64: 1, 2048>}]} {
    %c0 = arith.constant 0 : index
    %c0_0 = arith.constant 0 : index
    %0 = vector.load %arg1[%c0, %c0_0] : memref<1x2048xf32, #tpu.memory_space<vmem>>, vector<1x2048xf32>
    %c0_1 = arith.constant 0 : index
    %c0_2 = arith.constant 0 : index
    %1 = vector.load %arg2[%c0_1, %c0_2] : memref<1x2048xf32, #tpu.memory_space<vmem>>, vector<1x2048xf32>
    tpu.vector_store %arg2[%c0_1, %c0_2], %0 {strides = array<i32>} : memref<1x2048xf32, #tpu.memory_space<vmem>>, vector<1x2048xf32>,
    return
  }
  func.func @transform_0(%arg0: i32) -> (i32, i32) {
    %c0_i32 = arith.constant 0 : i32
    %c0_i32_0 = arith.constant 0 : i32
    return %arg0, %c0_i32 : i32, i32
  }
  func.func @transform_1(%arg0: i32) -> (i32, i32) {
    %c0_i32 = arith.constant 0 : i32
    %c0_i32_0 = arith.constant 0 : i32
    return %arg0, %c0_i32 : i32, i32
  }
}

</mosaic_0001>

<bundles_post_ra>
// kernel: encoder_forward.1
= control target key start
LH: loop header
LB: loop body
LE: loop exit
PB: predicated region body
PF: predicated region fallthrough
CT: control target
= control target key end

     0   :  { %s38_s0 = inlined_call_operand.vmem [shape: f32[1,2048], index: 0, kind: input, shape index: {}, may-alias: {0,1}]   ;;  %s39_s1 = inlined_call_operand.vmem [shape: f32[1,2048], index: 1, kind: output, shape index: {}, may-alias: {0,1}]  }
   0x1   :  { %v8_v0 = vld [vmem:[%s38_s0] sm:$0xff]  ;;  %v9_v1 = vld [vmem:[%s38_s0 + $0x8] sm:$0xff] }
   0x2   :  { %10 = vst [vmem:[%s39_s1] sm:$0xff] %v8_v0  ;;  %11 = vst [vmem:[%s39_s1 + $0x8] sm:$0xff] %v9_v1 }

</bundles_post_ra>
